<compile_context>
chip_gen: v7x
topology: tpu7x:2x2x1
jax: 0.10.0
libtpu: 0.0.40
codegen_flags: <defaults>
</compile_context>

<pallas_src>
import jax
import jax.numpy as jnp
import numpy as np
from jax.experimental import pallas as pl
from jax.experimental.pallas import tpu as pltpu

HIDDEN = 256
LANE = 128            # lane width: fc_mu columns padded to this for dense vst stores
SUBLANE = 8           # sublane granularity for the batch tile
MAX_TB = 2048         # batch-tile cap; sweep 512/1024/2048 per generation if desired
VMEM_LIMIT_BYTES = 64 << 20


def _round_up(n, m):
    return ((n + m - 1) // m) * m


def _cdiv(a, b):
    return (a + b - 1) // b


def actor_kernel(x_ref, w1_ref, b1_ref, w2_ref, b2_ref, w3_ref, b3_ref, o_ref):
    # One batch tile per grid step. Weights/biases are VMEM-resident (constant block
    # every step, single-buffered). bf16 MXU operands, f32 accumulate, f32 epilogue,
    # store in o_ref's dtype (f32 or bf16).
    x = x_ref[...].astype(jnp.bfloat16)   # no-op when the producer already emits bf16

    h1 = jnp.dot(x, w1_ref[...], preferred_element_type=jnp.float32) + b1_ref[...]
    h1 = jnp.maximum(h1, 0.0)

    h2 = jnp.dot(h1.astype(jnp.bfloat16), w2_ref[...],
                 preferred_element_type=jnp.float32) + b2_ref[...]
    h2 = jnp.maximum(h2, 0.0)

    mu = jnp.dot(h2.astype(jnp.bfloat16), w3_ref[...],
                 preferred_element_type=jnp.float32) + b3_ref[...]
    o_ref[...] = mu.astype(o_ref.dtype)


def prepare_params(params):
    """One-time prep (do once, reuse across calls): bf16 matmul weights, f32 biases,
    and a lane-dense (128-wide, zero-padded) fc_mu head."""
    w1, b1, w2, b2, w3, b3 = params
    out_size = int(w3.shape[1])
    out_pad = _round_up(max(out_size, LANE), LANE)

    w3p = jnp.zeros((w3.shape[0], out_pad), jnp.float32).at[:, :out_size].set(w3)
    b3p = jnp.zeros((1, out_pad), jnp.float32).at[:, :out_size].set(b3)

    prepped = (
        w1.astype(jnp.bfloat16), b1.astype(jnp.float32),
        w2.astype(jnp.bfloat16), b2.astype(jnp.float32),
        w3p.astype(jnp.bfloat16), b3p.astype(jnp.float32),
    )
    return prepped, out_size


def _choose_tile(batch):
    # Balanced tiles: bound padding to < SUBLANE rows per tile, and force >= 2 tiles
    # whenever the batch allows so "parallel" can shard across both v7x TensorCores
    # (neutral on single-TC v5e/v6e).
    n_tiles = max(1, _cdiv(batch, MAX_TB))
    if n_tiles < 2 and batch >= 2 * SUBLANE:
        n_tiles = 2
    tb = _round_up(_cdiv(batch, n_tiles), SUBLANE)
    nb = _cdiv(batch, tb)
    return tb, nb


def actor_forward(x, prepped_params, out_size, *, out_dtype=jnp.float32,
                  slice_output=True):
    """Fused actor forward.

    x may be f32 or bf16 (feed bf16 from the producer to halve activation DMA).
    out_dtype=jnp.bfloat16 halves output writeback on this HBM-bound kernel.
    slice_output=False returns the raw padded (batch_pad, 128) buffer with no extra
    XLA slice pass over HBM; note rows >= batch are NOT zero (bias propagates
    through the ReLUs), so the consumer must ignore/mask them; cols >= out_size
    are genuinely zero.
    """
    w1, b1, w2, b2, w3, b3 = prepped_params
    batch, in_size = x.shape
    out_pad = w3.shape[1]

    tb, nb = _choose_tile(batch)
    batch_pad = tb * nb
    if batch_pad != batch:
        x = jnp.pad(x, ((0, batch_pad - batch), (0, 0)))

    x_bytes = np.dtype(x.dtype).itemsize
    out_bytes = np.dtype(out_dtype).itemsize
    weight_bytes = sum(int(a.size) * np.dtype(a.dtype).itemsize
                       for a in (w1, b1, w2, b2, w3, b3))
    cost = pl.CostEstimate(
        flops=2 * batch_pad * (in_size * HIDDEN + HIDDEN * HIDDEN + HIDDEN * out_pad),
        transcendentals=0,
        bytes_accessed=batch_pad * (in_size * x_bytes + out_pad * out_bytes)
                       + weight_bytes,
    )

    def run(single_buffer_weights):
        if single_buffer_weights:
            # Constant index_map -> the block never changes; a single buffer drops the
            # pointless second weight buffer (~0.4 MiB) and its pipeline bookkeeping.
            def resident(shape):
                return pl.BlockSpec(shape, lambda i: (0, 0),
                                    pipeline_mode=pl.Buffered(1))
        else:
            def resident(shape):
                return pl.BlockSpec(shape, lambda i: (0, 0))

        return pl.pallas_call(
            actor_kernel,
            out_shape=jax.ShapeDtypeStruct((batch_pad, out_pad), out_dtype),
            grid=(nb,),
            in_specs=[
                pl.BlockSpec((tb, in_size), lambda i: (i, 0)),  # activations: batch-tiled
                resident(w1.shape), resident(b1.shape),
                resident(w2.shape), resident(b2.shape),
                resident(w3.shape), resident(b3.shape),
            ],
            out_specs=pl.BlockSpec((tb, out_pad), lambda i: (i, 0)),
            compiler_params=pltpu.CompilerParams(
                dimension_semantics=("parallel",),     # megacore sharding on v7x
                vmem_limit_bytes=VMEM_LIMIT_BYTES,
            ),
            cost_estimate=cost,
        )(x, w1, b1, w2, b2, w3, b3)

    try:
        out = run(single_buffer_weights=True)
    except Exception:
        # Fallback for toolchains that reject pipeline_mode=pl.Buffered(1):
        # identical kernel, default (double-buffered) resident specs.
        out = run(single_buffer_weights=False)

    if not slice_output:
        return out
    if batch_pad == batch and out_pad == out_size:
        return out
    return out[:batch, :out_size]


def init_params(key, input_size, output_size):
    # Deterministic init mimicking nn.Linear's U(-1/sqrt(fan_in), 1/sqrt(fan_in)).
    ks = jax.random.split(key, 6)

    def linear(kw, kb, fan_in, fan_out):
        bound = 1.0 / jnp.sqrt(fan_in)
        w = jax.random.uniform(kw, (fan_in, fan_out), jnp.float32, -bound, bound)
        b = jax.random.uniform(kb, (1, fan_out), jnp.float32, -bound, bound)
        return w, b

    w1, b1 = linear(ks[0], ks[1], input_size, HIDDEN)
    w2, b2 = linear(ks[2], ks[3], HIDDEN, HIDDEN)
    w3, b3 = linear(ks[4], ks[5], HIDDEN, output_size)
    return (w1, b1, w2, b2, w3, b3)


def actor_reference_f32(x, params):
    w1, b1, w2, b2, w3, b3 = params
    h1 = jax.nn.relu(x @ w1 + b1)
    h2 = jax.nn.relu(h1 @ w2 + b2)
    return h2 @ w3 + b3


def actor_reference_bf16(x, params):
    # Matched-precision reference (bf16 MXU operands, f32 accumulation).
    w1, b1, w2, b2, w3, b3 = params
    bf = jnp.bfloat16
    h1 = jax.nn.relu(jnp.dot(x.astype(bf), w1.astype(bf),
                             preferred_element_type=jnp.float32) + b1)
    h2 = jax.nn.relu(jnp.dot(h1.astype(bf), w2.astype(bf),
                             preferred_element_type=jnp.float32) + b2)
    return jnp.dot(h2.astype(bf), w3.astype(bf),
                   preferred_element_type=jnp.float32) + b3


if __name__ == "__main__":
    key = jax.random.PRNGKey(0)
    k_in, k_param = jax.random.split(key)

    batch, input_size, output_size = 8, 32, 8
    x = jax.random.normal(k_in, (batch, input_size), jnp.float32)
    params = init_params(k_param, input_size, output_size)

    prepped, out_size = prepare_params(params)   # one-time weight prep (bf16 + pad)

    # Path 1: f32 output, exact (batch, output_size) shape.
    out = actor_forward(x, prepped, out_size)
    jax.block_until_ready(out)
    assert out.shape == (batch, output_size)

    ref_bf16 = actor_reference_bf16(x, params)
    assert jnp.allclose(out, ref_bf16, atol=2e-3, rtol=2e-3)
    ref_f32 = actor_reference_f32(x, params)
    assert jnp.allclose(out, ref_f32, atol=5e-2, rtol=5e-2)

    # Path 2: bf16-in / bf16-out, unsliced padded buffer (minimum HBM traffic).
    # (The .astype here only simulates an upstream producer that already emits bf16.)
    out_padded = actor_forward(x.astype(jnp.bfloat16), prepped, out_size,
                               out_dtype=jnp.bfloat16, slice_output=False)
    jax.block_until_ready(out_padded)
    assert out_padded.shape == (batch, LANE) and out_padded.dtype == jnp.bfloat16
    assert jnp.allclose(out_padded[:batch, :out_size].astype(jnp.float32),
                        ref_bf16, atol=2e-2, rtol=2e-2)

    print("KERNEL_OK")
</pallas_src>

<mosaic_0001>
module attributes {stable_mosaic.version = 11 : i64} {
  func.func @actor_kernel(%arg0: i32, %arg1: memref<8x32xf32, #tpu.memory_space<vmem>>, %arg2: memref<32x256xbf16, #tpu.memory_space<vmem>>, %arg3: memref<1x256xf32, #tpu.memory_space<vmem>>, %arg4: memref<256x256xbf16, #tpu.memory_space<vmem>>, %arg5: memref<1x256xf32, #tpu.memory_space<vmem>>, %arg6: memref<256x128xbf16, #tpu.memory_space<vmem>>, %arg7: memref<1x128xf32, #tpu.memory_space<vmem>>, %arg8: memref<8x128xf32, #tpu.memory_space<vmem>>) attributes {dimension_semantics = [#tpu.dimension_semantics<parallel>], iteration_bounds = array<i64: 1>, scalar_prefetch = 0 : i64, scratch_operands = 0 : i64, tpu.core_type = #tpu.core_type<tc>, window_params = [{transform_indices = @transform_0, window_bounds = array<i64: 8, 32>}, {pipeline_mode = #tpu.pipeline_mode<synchronous>, transform_indices = @transform_1, window_bounds = array<i64: 32, 256>}, {pipeline_mode = #tpu.pipeline_mode<synchronous>, transform_indices = @transform_2, window_bounds = array<i64: 1, 256>}, {pipeline_mode = #tpu.pipeline_mode<synchronous>, transform_indices = @transform_3, window_bounds = array<i64: 256, 256>}, {pipeline_mode = #tpu.pipeline_mode<synchronous>, transform_indices = @transform_4, window_bounds = array<i64: 1, 256>}, {pipeline_mode = #tpu.pipeline_mode<synchronous>, transform_indices = @transform_5, window_bounds = array<i64: 256, 128>}, {pipeline_mode = #tpu.pipeline_mode<synchronous>, transform_indices = @transform_6, window_bounds = array<i64: 1, 128>}, {transform_indices = @transform_7, window_bounds = array<i64: 8, 128>}]} {
    %c0 = arith.constant 0 : index
    %c0_0 = arith.constant 0 : index
    %0 = vector.load %arg1[%c0, %c0_0] : memref<8x32xf32, #tpu.memory_space<vmem>>, vector<8x32xf32>
    %1 = arith.truncf %0 : vector<8x32xf32> to vector<8x32xbf16>
    %c0_1 = arith.constant 0 : index
    %c0_2 = arith.constant 0 : index
    %2 = vector.load %arg2[%c0_1, %c0_2] : memref<32x256xbf16, #tpu.memory_space<vmem>>, vector<32x256xbf16>
    %cst = arith.constant dense<0.000000e+00> : vector<8x256xf32>
    %3 = tpu.matmul %1, %2, %cst {dimension_numbers = #tpu.dot_dimension_numbers<[1], [0], [0], [1], [0, 0, 1, 1], [], []>} : vector<8x32xbf16>, vector<32x256xbf16>, vector<8x256xf32> -> vector<8x256xf32>
    %c0_3 = arith.constant 0 : index
    %c0_4 = arith.constant 0 : index
    %4 = vector.load %arg3[%c0_3, %c0_4] : memref<1x256xf32, #tpu.memory_space<vmem>>, vector<1x256xf32>
    %5 = vector.broadcast %4 : vector<1x256xf32> to vector<8x256xf32>
    %6 = arith.addf %3, %5 : vector<8x256xf32>
    %cst_5 = arith.constant 0.000000e+00 : f32
    %7 = vector.broadcast %cst_5 : f32 to vector<8x256xf32>
    %8 = arith.maximumf %6, %7 : vector<8x256xf32>
    %9 = arith.truncf %8 : vector<8x256xf32> to vector<8x256xbf16>
    %c0_6 = arith.constant 0 : index
    %c0_7 = arith.constant 0 : index
    %10 = vector.load %arg4[%c0_6, %c0_7] : memref<256x256xbf16, #tpu.memory_space<vmem>>, vector<256x256xbf16>
    %cst_8 = arith.constant dense<0.000000e+00> : vector<8x256xf32>
    %11 = tpu.matmul %9, %10, %cst_8 {dimension_numbers = #tpu.dot_dimension_numbers<[1], [0], [0], [1], [0, 0, 1, 1], [], []>} : vector<8x256xbf16>, vector<256x256xbf16>, vector<8x256xf32> -> vector<8x256xf32>
    %c0_9 = arith.constant 0 : index
    %c0_10 = arith.constant 0 : index
    %12 = vector.load %arg5[%c0_9, %c0_10] : memref<1x256xf32, #tpu.memory_space<vmem>>, vector<1x256xf32>
    %13 = vector.broadcast %12 : vector<1x256xf32> to vector<8x256xf32>
    %14 = arith.addf %11, %13 : vector<8x256xf32>
    %cst_11 = arith.constant 0.000000e+00 : f32
    %15 = vector.broadcast %cst_11 : f32 to vector<8x256xf32>
    %16 = arith.maximumf %14, %15 : vector<8x256xf32>
    %17 = arith.truncf %16 : vector<8x256xf32> to vector<8x256xbf16>
    %c0_12 = arith.constant 0 : index
    %c0_13 = arith.constant 0 : index
    %18 = vector.load %arg6[%c0_12, %c0_13] : memref<256x128xbf16, #tpu.memory_space<vmem>>, vector<256x128xbf16>
    %cst_14 = arith.constant dense<0.000000e+00> : vector<8x128xf32>
    %19 = tpu.matmul %17, %18, %cst_14 {dimension_numbers = #tpu.dot_dimension_numbers<[1], [0], [0], [1], [0, 0, 1, 1], [], []>} : vector<8x256xbf16>, vector<256x128xbf16>, vector<8x128xf32> -> vector<8x128xf32>
    %c0_15 = arith.constant 0 : index
    %c0_16 = arith.constant 0 : index
    %20 = vector.load %arg7[%c0_15, %c0_16] : memref<1x128xf32, #tpu.memory_space<vmem>>, vector<1x128xf32>
    %21 = vector.broadcast %20 : vector<1x128xf32> to vector<8x128xf32>
    %22 = arith.addf %19, %21 : vector<8x128xf32>
    %c0_17 = arith.constant 0 : index
    %c0_18 = arith.constant 0 : index
    %23 = vector.load %arg8[%c0_17, %c0_18] : memref<8x128xf32, #tpu.memory_space<vmem>>, vector<8x128xf32>
    tpu.vector_store %arg8[%c0_17, %c0_18], %22 {strides = array<i32>} : memref<8x128xf32, #tpu.memory_space<vmem>>, vector<8x128xf32>,
    return
  }
  func.func @transform_0(%arg0: i32) -> (i32, i32) {
    %c0_i32 = arith.constant 0 : i32
    %c0_i32_0 = arith.constant 0 : i32
    return %arg0, %c0_i32 : i32, i32
  }
  func.func @transform_1(%arg0: i32) -> (i32, i32) {
    %c0_i32 = arith.constant 0 : i32
    %c0_i32_0 = arith.constant 0 : i32
    %c0_i32_1 = arith.constant 0 : i32
    return %c0_i32, %c0_i32_0 : i32, i32
  }
  func.func @transform_2(%arg0: i32) -> (i32, i32) {
    %c0_i32 = arith.constant 0 : i32
    %c0_i32_0 = arith.constant 0 : i32
    %c0_i32_1 = arith.constant 0 : i32
    return %c0_i32, %c0_i32_0 : i32, i32
  }
  func.func @transform_3(%arg0: i32) -> (i32, i32) {
    %c0_i32 = arith.constant 0 : i32
    %c0_i32_0 = arith.constant 0 : i32
    %c0_i32_1 = arith.constant 0 : i32
    return %c0_i32, %c0_i32_0 : i32, i32
  }
  func.func @transform_4(%arg0: i32) -> (i32, i32) {
    %c0_i32 = arith.constant 0 : i32
    %c0_i32_0 = arith.constant 0 : i32
    %c0_i32_1 = arith.constant 0 : i32
    return %c0_i32, %c0_i32_0 : i32, i32
  }
  func.func @transform_5(%arg0: i32) -> (i32, i32) {
    %c0_i32 = arith.constant 0 : i32
    %c0_i32_0 = arith.constant 0 : i32
    %c0_i32_1 = arith.constant 0 : i32
    return %c0_i32, %c0_i32_0 : i32, i32
  }
  func.func @transform_6(%arg0: i32) -> (i32, i32) {
    %c0_i32 = arith.constant 0 : i32
    %c0_i32_0 = arith.constant 0 : i32
    %c0_i32_1 = arith.constant 0 : i32
    return %c0_i32, %c0_i32_0 : i32, i32
  }
  func.func @transform_7(%arg0: i32) -> (i32, i32) {
    %c0_i32 = arith.constant 0 : i32
    %c0_i32_0 = arith.constant 0 : i32
    return %arg0, %c0_i32 : i32, i32
  }
}

module attributes {stable_mosaic.version = 11 : i64} {
  func.func @actor_kernel(%arg0: i32, %arg1: memref<8x32xf32, #tpu.memory_space<vmem>>, %arg2: memref<32x256xbf16, #tpu.memory_space<vmem>>, %arg3: memref<1x256xf32, #tpu.memory_space<vmem>>, %arg4: memref<256x256xbf16, #tpu.memory_space<vmem>>, %arg5: memref<1x256xf32, #tpu.memory_space<vmem>>, %arg6: memref<256x128xbf16, #tpu.memory_space<vmem>>, %arg7: memref<1x128xf32, #tpu.memory_space<vmem>>, %arg8: memref<8x128xf32, #tpu.memory_space<vmem>>) attributes {dimension_semantics = [#tpu.dimension_semantics<parallel>], iteration_bounds = array<i64: 1>, scalar_prefetch = 0 : i64, scratch_operands = 0 : i64, tpu.core_type = #tpu.core_type<tc>, window_params = [{transform_indices = @transform_0, window_bounds = array<i64: 8, 32>}, {pipeline_mode = #tpu.pipeline_mode<synchronous>, transform_indices = @transform_1, window_bounds = array<i64: 32, 256>}, {pipeline_mode = #tpu.pipeline_mode<synchronous>, transform_indices = @transform_2, window_bounds = array<i64: 1, 256>}, {pipeline_mode = #tpu.pipeline_mode<synchronous>, transform_indices = @transform_3, window_bounds = array<i64: 256, 256>}, {pipeline_mode = #tpu.pipeline_mode<synchronous>, transform_indices = @transform_4, window_bounds = array<i64: 1, 256>}, {pipeline_mode = #tpu.pipeline_mode<synchronous>, transform_indices = @transform_5, window_bounds = array<i64: 256, 128>}, {pipeline_mode = #tpu.pipeline_mode<synchronous>, transform_indices = @transform_6, window_bounds = array<i64: 1, 128>}, {transform_indices = @transform_7, window_bounds = array<i64: 8, 128>}]} {
    %c0 = arith.constant 0 : index
    %c0_0 = arith.constant 0 : index
    %0 = vector.load %arg1[%c0, %c0_0] : memref<8x32xf32, #tpu.memory_space<vmem>>, vector<8x32xf32>
    %1 = arith.truncf %0 : vector<8x32xf32> to vector<8x32xbf16>
    %c0_1 = arith.constant 0 : index
    %c0_2 = arith.constant 0 : index
    %2 = vector.load %arg2[%c0_1, %c0_2] : memref<32x256xbf16, #tpu.memory_space<vmem>>, vector<32x256xbf16>
    %cst = arith.constant dense<0.000000e+00> : vector<8x256xf32>
    %3 = tpu.matmul %1, %2, %cst {dimension_numbers = #tpu.dot_dimension_numbers<[1], [0], [0], [1], [0, 0, 1, 1], [], []>} : vector<8x32xbf16>, vector<32x256xbf16>, vector<8x256xf32> -> vector<8x256xf32>
    %c0_3 = arith.constant 0 : index
    %c0_4 = arith.constant 0 : index
    %4 = vector.load %arg3[%c0_3, %c0_4] : memref<1x256xf32, #tpu.memory_space<vmem>>, vector<1x256xf32>
    %5 = vector.broadcast %4 : vector<1x256xf32> to vector<8x256xf32>
    %6 = arith.addf %3, %5 : vector<8x256xf32>
    %cst_5 = arith.constant 0.000000e+00 : f32
    %7 = vector.broadcast %cst_5 : f32 to vector<8x256xf32>
    %8 = arith.maximumf %6, %7 : vector<8x256xf32>
    %9 = arith.truncf %8 : vector<8x256xf32> to vector<8x256xbf16>
    %c0_6 = arith.constant 0 : index
    %c0_7 = arith.constant 0 : index
    %10 = vector.load %arg4[%c0_6, %c0_7] : memref<256x256xbf16, #tpu.memory_space<vmem>>, vector<256x256xbf16>
    %cst_8 = arith.constant dense<0.000000e+00> : vector<8x256xf32>
    %11 = tpu.matmul %9, %10, %cst_8 {dimension_numbers = #tpu.dot_dimension_numbers<[1], [0], [0], [1], [0, 0, 1, 1], [], []>} : vector<8x256xbf16>, vector<256x256xbf16>, vector<8x256xf32> -> vector<8x256xf32>
    %c0_9 = arith.constant 0 : index
    %c0_10 = arith.constant 0 : index
    %12 = vector.load %arg5[%c0_9, %c0_10] : memref<1x256xf32, #tpu.memory_space<vmem>>, vector<1x256xf32>
    %13 = vector.broadcast %12 : vector<1x256xf32> to vector<8x256xf32>
    %14 = arith.addf %11, %13 : vector<8x256xf32>
    %cst_11 = arith.constant 0.000000e+00 : f32
    %15 = vector.broadcast %cst_11 : f32 to vector<8x256xf32>
    %16 = arith.maximumf %14, %15 : vector<8x256xf32>
    %17 = arith.truncf %16 : vector<8x256xf32> to vector<8x256xbf16>
    %c0_12 = arith.constant 0 : index
    %c0_13 = arith.constant 0 : index
    %18 = vector.load %arg6[%c0_12, %c0_13] : memref<256x128xbf16, #tpu.memory_space<vmem>>, vector<256x128xbf16>
    %cst_14 = arith.constant dense<0.000000e+00> : vector<8x128xf32>
    %19 = tpu.matmul %17, %18, %cst_14 {dimension_numbers = #tpu.dot_dimension_numbers<[1], [0], [0], [1], [0, 0, 1, 1], [], []>} : vector<8x256xbf16>, vector<256x128xbf16>, vector<8x128xf32> -> vector<8x128xf32>
    %c0_15 = arith.constant 0 : index
    %c0_16 = arith.constant 0 : index
    %20 = vector.load %arg7[%c0_15, %c0_16] : memref<1x128xf32, #tpu.memory_space<vmem>>, vector<1x128xf32>
    %21 = vector.broadcast %20 : vector<1x128xf32> to vector<8x128xf32>
    %22 = arith.addf %19, %21 : vector<8x128xf32>
    %c0_17 = arith.constant 0 : index
    %c0_18 = arith.constant 0 : index
    %23 = vector.load %arg8[%c0_17, %c0_18] : memref<8x128xf32, #tpu.memory_space<vmem>>, vector<8x128xf32>
    tpu.vector_store %arg8[%c0_17, %c0_18], %22 {strides = array<i32>} : memref<8x128xf32, #tpu.memory_space<vmem>>, vector<8x128xf32>,
    return
  }
  func.func @transform_0(%arg0: i32) -> (i32, i32) {
    %c0_i32 = arith.constant 0 : i32
    %c0_i32_0 = arith.constant 0 : i32
    return %arg0, %c0_i32 : i32, i32
  }
  func.func @transform_1(%arg0: i32) -> (i32, i32) {
    %c0_i32 = arith.constant 0 : i32
    %c0_i32_0 = arith.constant 0 : i32
    %c0_i32_1 = arith.constant 0 : i32
    return %c0_i32, %c0_i32_0 : i32, i32
  }
  func.func @transform_2(%arg0: i32) -> (i32, i32) {
    %c0_i32 = arith.constant 0 : i32
    %c0_i32_0 = arith.constant 0 : i32
    %c0_i32_1 = arith.constant 0 : i32
    return %c0_i32, %c0_i32_0 : i32, i32
  }
  func.func @transform_3(%arg0: i32) -> (i32, i32) {
    %c0_i32 = arith.constant 0 : i32
    %c0_i32_0 = arith.constant 0 : i32
    %c0_i32_1 = arith.constant 0 : i32
    return %c0_i32, %c0_i32_0 : i32, i32
  }
  func.func @transform_4(%arg0: i32) -> (i32, i32) {
    %c0_i32 = arith.constant 0 : i32
    %c0_i32_0 = arith.constant 0 : i32
    %c0_i32_1 = arith.constant 0 : i32
    return %c0_i32, %c0_i32_0 : i32, i32
  }
  func.func @transform_5(%arg0: i32) -> (i32, i32) {
    %c0_i32 = arith.constant 0 : i32
    %c0_i32_0 = arith.constant 0 : i32
    %c0_i32_1 = arith.constant 0 : i32
    return %c0_i32, %c0_i32_0 : i32, i32
  }
  func.func @transform_6(%arg0: i32) -> (i32, i32) {
    %c0_i32 = arith.constant 0 : i32
    %c0_i32_0 = arith.constant 0 : i32
    %c0_i32_1 = arith.constant 0 : i32
    return %c0_i32, %c0_i32_0 : i32, i32
  }
  func.func @transform_7(%arg0: i32) -> (i32, i32) {
    %c0_i32 = arith.constant 0 : i32
    %c0_i32_0 = arith.constant 0 : i32
    return %arg0, %c0_i32 : i32, i32
  }
}

</mosaic_0001>

<bundles_post_ra>
// kernel: tpu_custom_call.1
= control target key start
LH: loop header
LB: loop body
LE: loop exit
PB: predicated region body
PF: predicated region fallthrough
CT: control target
= control target key end

     0   :  { %12 = vsyncpa [#allocation3], 0  ;;  %s1139_s0 = inlined_call_operand.hbm [shape: f32[8,32], index: 0, kind: input, shape index: {}]   ;;  %s1140_s1 = inlined_call_operand.hbm [shape: bf16[32,256], index: 1, kind: input, shape index: {}]   ;;  %s1141_s2 = inlined_call_operand.hbm [shape: f32[1,256], index: 2, kind: input, shape index: {}]   ;;  %s1142_s3 = inlined_call_operand.hbm [shape: bf16[256,256], index: 3, kind: input, shape index: {}]   ;;  %s1143_s4 = inlined_call_operand.hbm [shape: f32[1,256], index: 4, kind: input, shape index: {}]   ;;  %s1144_s5 = inlined_call_operand.hbm [shape: bf16[256,128], index: 5, kind: input, shape index: {}]   ;;  %s1145_s6 = inlined_call_operand.hbm [shape: f32[1,128], index: 6, kind: input, shape index: {}]   ;;  %s1146_s7 = inlined_call_operand.hbm [shape: f32[8,128], index: 7, kind: output, shape index: {}]  }
   0x1   :  { %13 = vsyncpa [#allocation6], 0 }
   0x2   :  { %14 = vsyncpa [#allocation9], 0 }
   0x3   :  { %15 = vsyncpa [#allocation12], 0 }
   0x4   :  { %16 = vsyncpa [#allocation4], 0  ;;  %s990_s24 = smov [#allocation5]   ;;  %s804_s28 = scalar_lea.hbm %s1140_s1, 512 }
   0x5   :  { %s32_s25 = sshll.u32 %s990_s24, 4  ;;  %p805_p0 = scmp.ne.s32.totalorder %s1140_s1, %s804_s28  ;;  %s33_s25 = int_to_ptr.vmem [resolvable:$true] %s32_s25 }
   0x6   :  { %p808_p1 = scmp.lt.u32.totalorder %s804_s28, %s1140_s1 }
   0x8   :  { %p810_p2 = pnand %p808_p1, %p805_p0 }
   0xa   :  { %813 = shalt.err (!%p810_p2)
}
   0xb   :  { %s814_s10 = scalar_lea.vmem %s33_s25, 512  ;;  %p819_p4 = scmp.lt.s32.totalorder %s33_s25, %s33_s25 }
   0xc   :  { %p815_p3 = scmp.ne.s32.totalorder %s33_s25, %s814_s10  ;;  %p820_p5 = scmp.lt.s32.totalorder %s814_s10, %s814_s10 }
   0xe   :  { %p821_p6 = por %p820_p5, %p819_p4 }
  0x10   :  { %p822_p7 = pnand %p821_p6, %p815_p3 }
  0x12   :  { %825 = shalt.err (!%p822_p7)
}
  0x13   :  { %s991_s11 = smov 128   ;;  %s992_s12 = smov 8  }
  0x14   :  { %38 = dma.hbm_to_vmem [thread:$0]  %s1140_s1, 512, %s33_s25, [#allocation6], %s991_s11, %s991_s11, %s992_s12  }
  0x15   :  { %s993_s15 = smov [#allocation8]   ;;  %s994_s17 = smov [#allocation11]  }
  0x16   :  { %s54_s16 = sshll.u32 %s993_s15, 4  ;;  %s76_s18 = sshll.u32 %s994_s17, 4  ;;  %s55_s16 = int_to_ptr.vmem [resolvable:$true] %s54_s16  ;;  %s77_s18 = int_to_ptr.vmem [resolvable:$true] %s76_s18 }
  0x17   :  { %s826_s21 = scalar_lea.hbm %s1142_s3, 4096 }
  0x18   :  { %p827_p8 = scmp.ne.s32.totalorder %s1142_s3, %s826_s21  ;;  %p830_p9 = scmp.lt.u32.totalorder %s826_s21, %s1142_s3 }
  0x1a   :  { %p832_p10 = pnand %p830_p9, %p827_p8 }
  0x1c   :  { %835 = shalt.err (!%p832_p10)
}
  0x1d   :  { %s836_s1 = scalar_lea.vmem %s55_s16, 4096  ;;  %p841_p12 = scmp.lt.s32.totalorder %s55_s16, %s55_s16 }
  0x1e   :  { %p837_p11 = scmp.ne.s32.totalorder %s55_s16, %s836_s1  ;;  %p842_p13 = scmp.lt.s32.totalorder %s836_s1, %s836_s1 }
  0x20   :  { %p843_p0 = por %p842_p13, %p841_p12 }
  0x22   :  { %p844_p1 = pnand %p843_p0, %p837_p11 }
  0x24   :  { %847 = shalt.err (!%p844_p1)
}
  0x25   :  { %60 = dma.hbm_to_vmem [thread:$0]  %s1142_s3, 4096, %s55_s16, [#allocation9], %s991_s11, %s991_s11, %s992_s12  }
  0x26   :  { %s848_s30 = scalar_lea.hbm %s1144_s5, 2048 }
  0x27   :  { %p849_p2 = scmp.ne.s32.totalorder %s1144_s5, %s848_s30  ;;  %p852_p3 = scmp.lt.u32.totalorder %s848_s30, %s1144_s5 }
  0x29   :  { %p854_p4 = pnand %p852_p3, %p849_p2 }
  0x2b   :  { %857 = shalt.err (!%p854_p4)
}
  0x2c   :  { %s858_s14 = scalar_lea.vmem %s77_s18, 2048  ;;  %p863_p6 = scmp.lt.s32.totalorder %s77_s18, %s77_s18 }
  0x2d   :  { %p859_p5 = scmp.ne.s32.totalorder %s77_s18, %s858_s14  ;;  %p864_p7 = scmp.lt.s32.totalorder %s858_s14, %s858_s14 }
  0x2f   :  { %p865_p8 = por %p864_p7, %p863_p6 }
  0x31   :  { %p866_p9 = pnand %p865_p8, %p859_p5 }
  0x33   :  { %869 = shalt.err (!%p866_p9)
}
  0x34   :  { %s995_s3 = smov 64   ;;  %s996_s11 = smov 4  }
  0x35   :  { %82 = dma.hbm_to_vmem [thread:$0]  %s1144_s5, 2048, %s77_s18, [#allocation12], %s995_s3, %s995_s3, %s996_s11  }
  0x36   :  { %s997_s16 = smov [#allocation2]   ;;  %s998_s19 = smov [#allocation7]  }
  0x37   :  { %s23_s17 = sshll.u32 %s997_s16, 4  ;;  %s45_s20 = sshll.u32 %s998_s19, 4  ;;  %s24_s17 = int_to_ptr.vmem [resolvable:$true] %s23_s17  ;;  %s46_s20 = int_to_ptr.vmem [resolvable:$true] %s45_s20 }
  0x38   :  { %s870_s23 = scalar_lea.hbm %s1139_s0, 128 }
  0x39   :  { %p871_p10 = scmp.ne.s32.totalorder %s1139_s0, %s870_s23  ;;  %p874_p11 = scmp.lt.u32.totalorder %s870_s23, %s1139_s0 }
  0x3b   :  { %p876_p12 = pnand %p874_p11, %p871_p10 }
  0x3d   :  { %879 = shalt.err (!%p876_p12)
}
  0x3e   :  { %s880_s5 = scalar_lea.vmem %s24_s17, 128  ;;  %p885_p0 = scmp.lt.s32.totalorder %s24_s17, %s24_s17 }
  0x3f   :  { %p881_p13 = scmp.ne.s32.totalorder %s24_s17, %s880_s5  ;;  %p886_p1 = scmp.lt.s32.totalorder %s880_s5, %s880_s5 }
  0x41   :  { %p887_p2 = por %p886_p1, %p885_p0 }
  0x43   :  { %p888_p3 = pnand %p887_p2, %p881_p13 }
  0x45   :  { %891 = shalt.err (!%p888_p3)
}
  0x46   :  { %26 = dma.hbm_to_vmem [thread:$0]  %s1139_s0, 128, %s24_s17, [#allocation3]  }
  0x47   :  { %s892_s30 = scalar_lea.hbm %s1141_s2, 32 }
  0x48   :  { %p893_p4 = scmp.ne.s32.totalorder %s1141_s2, %s892_s30  ;;  %p896_p5 = scmp.lt.u32.totalorder %s892_s30, %s1141_s2 }
  0x4a   :  { %p898_p6 = pnand %p896_p5, %p893_p4 }
  0x4c   :  { %901 = shalt.err (!%p898_p6)
}
  0x4d   :  { %s902_s14 = scalar_lea.vmem %s46_s20, 32  ;;  %p907_p8 = scmp.lt.s32.totalorder %s46_s20, %s46_s20 }
  0x4e   :  { %p903_p7 = scmp.ne.s32.totalorder %s46_s20, %s902_s14  ;;  %p908_p9 = scmp.lt.s32.totalorder %s902_s14, %s902_s14 }
  0x50   :  { %p909_p10 = por %p908_p9, %p907_p8 }
  0x52   :  { %p910_p11 = pnand %p909_p10, %p903_p7 }
  0x54   :  { %913 = shalt.err (!%p910_p11)
}
  0x55   :  { %48 = dma.hbm_to_vmem [thread:$0]  %s1141_s2, 32, %s46_s20, [#allocation6]  }
  0x56   :  { %s999_s11 = smov [#allocation10]   ;;  %s1000_s15 = smov [#allocation13]  }
  0x57   :  { %s67_s12 = sshll.u32 %s999_s11, 4  ;;  %s89_s16 = sshll.u32 %s1000_s15, 4  ;;  %s68_s12 = int_to_ptr.vmem [resolvable:$true] %s67_s12  ;;  %s90_s16 = int_to_ptr.vmem [resolvable:$true] %s89_s16 }
  0x58   :  { %s914_s21 = scalar_lea.hbm %s1143_s4, 32 }
  0x59   :  { %p915_p12 = scmp.ne.s32.totalorder %s1143_s4, %s914_s21  ;;  %p918_p13 = scmp.lt.u32.totalorder %s914_s21, %s1143_s4 }
  0x5b   :  { %p920_p0 = pnand %p918_p13, %p915_p12 }
  0x5d   :  { %923 = shalt.err (!%p920_p0)
}
  0x5e   :  { %s924_s2 = scalar_lea.vmem %s68_s12, 32  ;;  %p929_p2 = scmp.lt.s32.totalorder %s68_s12, %s68_s12 }
  0x5f   :  { %p925_p1 = scmp.ne.s32.totalorder %s68_s12, %s924_s2  ;;  %p930_p3 = scmp.lt.s32.totalorder %s924_s2, %s924_s2 }
  0x61   :  { %p931_p4 = por %p930_p3, %p929_p2 }
  0x63   :  { %p932_p5 = pnand %p931_p4, %p925_p1 }
  0x65   :  { %935 = shalt.err (!%p932_p5)
}
  0x66   :  { %70 = dma.hbm_to_vmem [thread:$0]  %s1143_s4, 32, %s68_s12, [#allocation9]  }
  0x67   :  { %s936_s18 = scalar_lea.hbm %s1145_s6, 16 }
  0x68   :  { %p937_p6 = scmp.ne.s32.totalorder %s1145_s6, %s936_s18  ;;  %p940_p7 = scmp.lt.u32.totalorder %s936_s18, %s1145_s6 }
  0x6a   :  { %p942_p8 = pnand %p940_p7, %p937_p6 }
  0x6c   :  { %945 = shalt.err (!%p942_p8)
}
  0x6d   :  { %s946_s8 = scalar_lea.vmem %s90_s16, 16  ;;  %s950_s9 = scalar_lea.vmem %s90_s16, 32 }
  0x6e   :  { %p947_p9 = scmp.ne.s32.totalorder %s90_s16, %s946_s8  ;;  %p951_p10 = scmp.lt.s32.totalorder %s90_s16, %s90_s16 }
  0x6f   :  { %p952_p11 = scmp.lt.s32.totalorder %s950_s9, %s946_s8 }
  0x71   :  { %p953_p12 = por %p952_p11, %p951_p10 }
  0x73   :  { %p954_p13 = pnand %p953_p12, %p947_p9 }
  0x75   :  { %957 = shalt.err (!%p954_p13)
}
  0x76   :  { %92 = dma.hbm_to_vmem [thread:$0]  %s1145_s6, 16, %s90_s16, [#allocation12]  }
  0x77   :  { %980 = dma.done.wait [#allocation3], 128  }
  0x78   :  { %981 = vsyncadd [#allocation3], 4294967168 }
  0x79   :  { %982 = dma.done.wait [#allocation6], 544  }
  0x7a   :  { %983 = vsyncadd [#allocation6], 4294966752 }
  0x7b   :  { %984 = dma.done.wait [#allocation9], 4128  }
  0x7c   :  { %985 = vsyncadd [#allocation9], 4294963168 }
  0x7d   :  { %986 = dma.done.wait [#allocation12], 2064  }
  0x7e   :  { %987 = vsyncadd [#allocation12], 4294965232  ;;  %v1001_v0 = vmov 0   ;;  %v734_v1 = vld [vmem:[#allocation5 + $0x4] ss:$8 sps:$4 sm:$0xff]   ;;  %v115_v5 = vld [vmem:[#allocation2] sm:$0xff]  ;;  %v123_v51 = vlaneseq }
  0x7f   :  { %189 = vmatprep.mubr.bf16.mxu0 %v1001_v0  ;;  %v736_v2 = vld [vmem:[#allocation5] ss:$8 sps:$4 sm:$0xff]   ;;  %157 = vmatprep.subr.bf16.mxu0 %v734_v1  ;;  %v737_v3 = vld [vmem:[#allocation5 + $0x14] ss:$8 sps:$4 sm:$0xff]   ;;  %v739_v4 = vld [vmem:[#allocation5 + $0x10] ss:$8 sps:$4 sm:$0xff]   ;;  %v116_v9 = vpack.c.bf16 %v115_v5, %v115_v5 }
  0x80   :  { %158 = vmatpush1.bf16.msra.mxu0 %v736_v2  ;;  %v740_v6 = vld [vmem:[#allocation8 + $0x4] ss:$8 sps:$4 sm:$0xff]   ;;  %v742_v7 = vld [vmem:[#allocation8] ss:$8 sps:$4 sm:$0xff]   ;;  %v743_v8 = vld [vmem:[#allocation8 + $0x14] ss:$8 sps:$4 sm:$0xff]  }
  0x81   :  { %159 = vmatprep.subr.bf16.mxu0 %v737_v3  ;;  %406 = vmatprep.subr.bf16.mxu1 %v740_v6  ;;  %v745_v10 = vld [vmem:[#allocation8 + $0x10] ss:$8 sps:$4 sm:$0xff]   ;;  %vm153_vm0 = vcmask 261120   ;;  %v746_v11 = vld [vmem:[#allocation8 + $0x24] ss:$8 sps:$4 sm:$0xff]   ;;  %v124_v52 = vshrl.u32 %v123_v51, 7 }
  0x82   :  { %407 = vmatpush1.bf16.msra.mxu1 %v742_v7  ;;  %v748_v12 = vld [vmem:[#allocation8 + $0x20] ss:$8 sps:$4 sm:$0xff]   ;;  %v749_v13 = vld [vmem:[#allocation8 + $0x34] ss:$8 sps:$4 sm:$0xff]   ;;  %v751_v14 = vld [vmem:[#allocation8 + $0x30] ss:$8 sps:$4 sm:$0xff]  }
  0x83   :  { %408 = vmatprep.subr.bf16.mxu1 %v743_v8  ;;  %v752_v15 = vld [vmem:[#allocation8 + $0x44] ss:$8 sps:$4 sm:$0xff]   ;;  %v754_v16 = vld [vmem:[#allocation8 + $0x40] ss:$8 sps:$4 sm:$0xff]   ;;  %v755_v17 = vld [vmem:[#allocation8 + $0x54] ss:$8 sps:$4 sm:$0xff]  }
  0x84   :  { %160 = vmatpush1.bf16.msra.mxu0 %v739_v4  ;;  %v757_v18 = vld [vmem:[#allocation8 + $0x50] ss:$8 sps:$4 sm:$0xff]   ;;  %v758_v19 = vld [vmem:[#allocation8 + $0x64] ss:$8 sps:$4 sm:$0xff]   ;;  %v760_v20 = vld [vmem:[#allocation8 + $0x60] ss:$8 sps:$4 sm:$0xff]  }
  0x85   :  { %v761_v21 = vld [vmem:[#allocation8 + $0x74] ss:$8 sps:$4 sm:$0xff]   ;;  %v763_v22 = vld [vmem:[#allocation8 + $0x70] ss:$8 sps:$4 sm:$0xff]   ;;  %v764_v23 = vld [vmem:[#allocation8 + $0x84] ss:$8 sps:$4 sm:$0xff]  }
  0x86   :  { %409 = vmatpush1.bf16.msra.mxu1 %v745_v10  ;;  %v766_v24 = vld [vmem:[#allocation8 + $0x80] ss:$8 sps:$4 sm:$0xff]   ;;  %v767_v25 = vld [vmem:[#allocation8 + $0x94] ss:$8 sps:$4 sm:$0xff]   ;;  %v769_v26 = vld [vmem:[#allocation8 + $0x90] ss:$8 sps:$4 sm:$0xff]  }
  0x87   :  { %649 = vmatmul.mubr.msk.bf16.vlgmr.msra.gmra.mrb[0].mxu0 %vm153_vm0, %v116_v9  ;;  %410 = vmatprep.subr.bf16.mxu1 %v746_v11  ;;  %v770_v27 = vld [vmem:[#allocation8 + $0xa4] ss:$8 sps:$4 sm:$0xff]   ;;  %v772_v28 = vld [vmem:[#allocation8 + $0xa0] ss:$8 sps:$4 sm:$0xff]   ;;  %v773_v29 = vld [vmem:[#allocation8 + $0xb4] ss:$8 sps:$4 sm:$0xff]  }
  0x88   :  { %v775_v30 = vld [vmem:[#allocation8 + $0xb0] ss:$8 sps:$4 sm:$0xff]   ;;  %v776_v31 = vld [vmem:[#allocation8 + $0xc4] ss:$8 sps:$4 sm:$0xff]   ;;  %v778_v32 = vld [vmem:[#allocation8 + $0xc0] ss:$8 sps:$4 sm:$0xff]  }
  0x89   :  { %v779_v33 = vld [vmem:[#allocation8 + $0xd4] ss:$8 sps:$4 sm:$0xff]   ;;  %v781_v34 = vld [vmem:[#allocation8 + $0xd0] ss:$8 sps:$4 sm:$0xff]   ;;  %v782_v35 = vld [vmem:[#allocation8 + $0xe4] ss:$8 sps:$4 sm:$0xff]  }
  0x8a   :  { %411 = vmatpush1.bf16.msra.mxu1 %v748_v12  ;;  %v784_v36 = vld [vmem:[#allocation8 + $0xe0] ss:$8 sps:$4 sm:$0xff]   ;;  %v785_v37 = vld [vmem:[#allocation8 + $0xf4] ss:$8 sps:$4 sm:$0xff]   ;;  %v787_v38 = vld [vmem:[#allocation8 + $0xf0] ss:$8 sps:$4 sm:$0xff]  }
  0x8b   :  { %412 = vmatprep.subr.bf16.mxu1 %v749_v13  ;;  %v788_v39 = vld [vmem:[#allocation11 + $0x40] sm:$0xff]   ;;  %v790_v41 = vld [vmem:[#allocation11 + $0x48] sm:$0xff]   ;;  %v792_v43 = vld [vmem:[#allocation11 + $0x50] sm:$0xff]   ;;  %v125_v53 = vsub.s32 0, %v124_v52  ;;  %v129_v55 = vsub.s32 1, %v124_v52  ;;  %s1002_s6 = smov [#allocation14]  }
  0x8c   :  { %v789_v40 = vld [vmem:[#allocation11] sm:$0xff]   ;;  %699 = vmatprep.subr.bf16.mxu0 %v788_v39  ;;  %v791_v42 = vld [vmem:[#allocation11 + $0x8] sm:$0xff]   ;;  %v793_v44 = vld [vmem:[#allocation11 + $0x10] sm:$0xff]   ;;  %s633_s13 = sshll.u32 %s1002_s6, 4  ;;  %s634_s13 = int_to_ptr.vmem [resolvable:$true] %s633_s13 }
  0x8d   :  { %700 = vmatpush3.bf16.msra.mxu0 %v789_v40  ;;  %v794_v45 = vld [vmem:[#allocation11 + $0x58] sm:$0xff]   ;;  %v796_v47 = vld [vmem:[#allocation11 + $0x60] sm:$0xff]   ;;  %v798_v49 = vld [vmem:[#allocation11 + $0x68] sm:$0xff]   ;;  %s958_s14 = scalar_lea.vmem %s634_s13, 128  ;;  %p963_p1 = scmp.lt.s32.totalorder %s634_s13, %s634_s13 }
  0x8e   :  { %413 = vmatpush1.bf16.msra.mxu1 %v751_v14  ;;  %701 = vmatprep.subr.bf16.mxu0 %v790_v41  ;;  %v795_v46 = vld [vmem:[#allocation11 + $0x18] sm:$0xff]   ;;  %v797_v48 = vld [vmem:[#allocation11 + $0x20] sm:$0xff]   ;;  %v799_v50 = vld [vmem:[#allocation11 + $0x28] sm:$0xff]   ;;  %p959_p0 = scmp.ne.s32.totalorder %s634_s13, %s958_s14  ;;  %p964_p2 = scmp.lt.s32.totalorder %s958_s14, %s958_s14 }
  0x8f   :  { %414 = vmatprep.subr.bf16.mxu1 %v752_v15  ;;  %v121_v54 = vld [vmem:[#allocation7] sm:$0x3]  ;;  %v800_v4 = vld [vmem:[#allocation11 + $0x70] sm:$0xff]   ;;  %v234_v8 = vld [vmem:[#allocation10] sm:$0x3] }
  0x90   :  { %v126_v56 = vrot.slane %v121_v54, %v125_v53  ;;  %v130_v57 = vrot.slane %v121_v54, %v129_v55  ;;  %v801_v5 = vld [vmem:[#allocation11 + $0x30] sm:$0xff]   ;;  %v802_v6 = vld [vmem:[#allocation11 + $0x78] sm:$0xff]   ;;  %v239_v9 = vrot.slane %v234_v8, %v125_v53  ;;  %v243_v10 = vrot.slane %v234_v8, %v129_v55  ;;  %p965_p3 = por %p964_p2, %p963_p1 }
  0x91   :  { %702 = vmatpush3.bf16.msra.mxu0 %v791_v42  ;;  %v803_v7 = vld [vmem:[#allocation11 + $0x38] sm:$0xff]  }
  0x92   :  { %415 = vmatpush1.bf16.msra.mxu1 %v754_v16  ;;  %703 = vmatprep.subr.bf16.mxu0 %v792_v43  ;;  %p966_p4 = pnand %p965_p3, %p959_p0 }
  0x93   :  { %416 = vmatprep.subr.bf16.mxu1 %v755_v17 }
  0x95   :  { %704 = vmatpush3.bf16.msra.mxu0 %v793_v44 }
  0x96   :  { %417 = vmatpush1.bf16.msra.mxu1 %v757_v18  ;;  %705 = vmatprep.subr.bf16.mxu0 %v794_v45 }
  0x97   :  { %418 = vmatprep.subr.bf16.mxu1 %v758_v19 }
  0x99   :  { %706 = vmatpush3.bf16.msra.mxu0 %v795_v46 }
  0x9a   :  { %419 = vmatpush1.bf16.msra.mxu1 %v760_v20  ;;  %707 = vmatprep.subr.bf16.mxu0 %v796_v47 }
  0x9b   :  { %420 = vmatprep.subr.bf16.mxu1 %v761_v21 }
  0x9d   :  { %708 = vmatpush3.bf16.msra.mxu0 %v797_v48 }
  0x9e   :  { %421 = vmatpush1.bf16.msra.mxu1 %v763_v22  ;;  %709 = vmatprep.subr.bf16.mxu0 %v798_v49  ;;  %v682_v22 = vld [vmem:[#allocation13] ss:$0 sm:$0xff] }
  0x9f   :  { %422 = vmatprep.subr.bf16.mxu1 %v764_v23 }
  0xa1   :  { %710 = vmatpush3.bf16.msra.mxu0 %v799_v50 }
  0xa2   :  { %423 = vmatpush1.bf16.msra.mxu1 %v766_v24  ;;  %711 = vmatprep.subr.bf16.mxu0 %v800_v4 }
  0xa3   :  { %424 = vmatprep.subr.bf16.mxu1 %v767_v25 }
  0xa5   :  { %712 = vmatpush3.bf16.msra.mxu0 %v801_v5 }
  0xa6   :  { %425 = vmatpush1.bf16.msra.mxu1 %v769_v26  ;;  %713 = vmatprep.subr.bf16.mxu0 %v802_v6 }
  0xa7   :  { %426 = vmatprep.subr.bf16.mxu1 %v770_v27 }
  0xa9   :  { %714 = vmatpush3.bf16.msra.mxu0 %v803_v7 }
  0xaa   :  { %427 = vmatpush1.bf16.msra.mxu1 %v772_v28 }
  0xab   :  { %428 = vmatprep.subr.bf16.mxu1 %v773_v29 }
  0xae   :  { %429 = vmatpush1.bf16.msra.mxu1 %v775_v30 }
  0xaf   :  { %430 = vmatprep.subr.bf16.mxu1 %v776_v31 }
  0xb2   :  { %431 = vmatpush1.bf16.msra.mxu1 %v778_v32 }
  0xb3   :  { %432 = vmatprep.subr.bf16.mxu1 %v779_v33 }
  0xb6   :  { %433 = vmatpush1.bf16.msra.mxu1 %v781_v34 }
  0xb7   :  { %434 = vmatprep.subr.bf16.mxu1 %v782_v35 }
  0xba   :  { %435 = vmatpush1.bf16.msra.mxu1 %v784_v36 }
  0xbb   :  { %436 = vmatprep.subr.bf16.mxu1 %v785_v37 }
  0xbe   :  { %437 = vmatpush1.bf16.msra.mxu1 %v787_v38 }
 0x15a   :  { %v191_v58 = vpop.f32.mrb[0].mxu0 }
 0x15b   :  { %v192_v59 = vadd.f32 %v191_v58, %v126_v56  ;;  %v193_v60 = vpop.f32.mrb[1].mxu0 }
 0x15c   :  { %v194_v61 = vadd.f32 %v193_v60, %v130_v57  ;;  %v195_v62 = vpop.f32.mrb[2].mxu0 }
 0x15d   :  { %v198_v63 = vmax.f32 %v192_v59, 0.0  ;;  %v196_v0 = vpop.f32.mrb[3].mxu0 }
 0x15e   :  { %v199_v1 = vmax.f32 %v194_v61, 0.0 }
 0x15f   :  { %v200_v3 = vpack.c.bf16 %v198_v63, %v198_v63 }
 0x160   :  { %v201_v2 = vpack.c.bf16 %v199_v1, %v199_v1 }
 0x162   :  { %438 = vmatprep.mubr.bf16.mxu1 %v201_v2 }
 0x163   :  { %439 = vmatmul.mubr.bf16.vlgmr.msra.gmra.mrb[0].mxu1 %v200_v3 }
 0x236   :  { %v440_v11 = vpop.f32.mrb[0].mxu1 }
 0x237   :  { %v441_v12 = vadd.f32 %v440_v11, %v239_v9  ;;  %v442_v13 = vpop.f32.mrb[1].mxu1 }
 0x238   :  { %v443_v14 = vadd.f32 %v442_v13, %v243_v10  ;;  %v444_v15 = vpop.f32.mrb[2].mxu1 }
 0x239   :  { %v447_v16 = vmax.f32 %v441_v12, 0.0  ;;  %v445_v17 = vpop.f32.mrb[3].mxu1 }
 0x23a   :  { %v448_v18 = vmax.f32 %v443_v14, 0.0 }
 0x23b   :  { %v449_v20 = vpack.c.bf16 %v447_v16, %v447_v16 }
 0x23c   :  { %v450_v19 = vpack.c.bf16 %v448_v18, %v448_v18 }
 0x23e   :  { %618 = vmatprep.mubr.bf16.mxu0 %v450_v19 }
 0x23f   :  { %619 = vmatmul.mubr.bf16.vlgmr.msra.gmra.mrb[4].mxu0 %v449_v20 }
 0x312   :  { %v715_v21 = vpop.f32.mrb[4].mxu0 }
 0x313   :  { %v716_v23 = vpop.f32.mrb[5].mxu0 }
 0x314   :  { %v717_v24 = vadd.f32 %v716_v23, %v715_v21  ;;  %v718_v25 = vpop.f32.mrb[6].mxu0 }
 0x315   :  { %v719_v26 = vpop.f32.mrb[7].mxu0 }
 0x316   :  { %v621_v27 = vadd.f32 %v717_v24, %v682_v22 }
 0x318   :  { %626 = vst [vmem:[#allocation14] sm:$0xff] %v621_v27 }
 0x319   :  { %969 = shalt.err (!%p966_p4)
}
 0x31a   :  { %s970_s11 = scalar_lea.hbm %s1146_s7, 128 }
 0x31b   :  { %p971_p5 = scmp.ne.s32.totalorder %s1146_s7, %s970_s11  ;;  %p974_p6 = scmp.lt.u32.totalorder %s970_s11, %s1146_s7 }
 0x31d   :  { %p976_p7 = pnand %p974_p6, %p971_p5 }
 0x31f   :  { %979 = shalt.err (!%p976_p7)
}
 0x320   :  { %636 = dma.vmem_to_hbm [thread:$0]  %s634_s13, 128, %s1146_s7, [#allocation4]  }
 0x321   :  { %988 = dma.done.wait [#allocation4], 128  }
 0x322   :  { %989 = vsyncadd [#allocation4], 4294967168 }
 0x323   :  { %640 = vsyncpa [#allocation3], 1 }
 0x324   :  { %641 = vsyncpa [#allocation6], 1 }
 0x325   :  { %642 = vsyncpa [#allocation9], 1 }
 0x326   :  { %643 = vsyncpa [#allocation12], 1 }
 0x327   :  { %644 = vsyncpa [#allocation4], 1 }

// kernel: tpu_custom_call.1
= control target key start
LH: loop header
LB: loop body
LE: loop exit
PB: predicated region body
PF: predicated region fallthrough
CT: control target
= control target key end

     0   :  { %12 = vsyncpa [#allocation3], 0  ;;  %s1139_s0 = inlined_call_operand.hbm [shape: f32[8,32], index: 0, kind: input, shape index: {}]   ;;  %s1140_s1 = inlined_call_operand.hbm [shape: bf16[32,256], index: 1, kind: input, shape index: {}]   ;;  %s1141_s2 = inlined_call_operand.hbm [shape: f32[1,256], index: 2, kind: input, shape index: {}]   ;;  %s1142_s3 = inlined_call_operand.hbm [shape: bf16[256,256], index: 3, kind: input, shape index: {}]   ;;  %s1143_s4 = inlined_call_operand.hbm [shape: f32[1,256], index: 4, kind: input, shape index: {}]   ;;  %s1144_s5 = inlined_call_operand.hbm [shape: bf16[256,128], index: 5, kind: input, shape index: {}]   ;;  %s1145_s6 = inlined_call_operand.hbm [shape: f32[1,128], index: 6, kind: input, shape index: {}]   ;;  %s1146_s7 = inlined_call_operand.hbm [shape: f32[8,128], index: 7, kind: output, shape index: {}]  }
   0x1   :  { %13 = vsyncpa [#allocation6], 0 }
   0x2   :  { %14 = vsyncpa [#allocation9], 0 }
   0x3   :  { %15 = vsyncpa [#allocation12], 0 }
   0x4   :  { %16 = vsyncpa [#allocation4], 0  ;;  %s990_s24 = smov [#allocation5]   ;;  %s804_s28 = scalar_lea.hbm %s1140_s1, 512 }
   0x5   :  { %s32_s25 = sshll.u32 %s990_s24, 4  ;;  %p805_p0 = scmp.ne.s32.totalorder %s1140_s1, %s804_s28  ;;  %s33_s25 = int_to_ptr.vmem [resolvable:$true] %s32_s25 }
   0x6   :  { %p808_p1 = scmp.lt.u32.totalorder %s804_s28, %s1140_s1 }
   0x8   :  { %p810_p2 = pnand %p808_p1, %p805_p0 }
   0xa   :  { %813 = shalt.err (!%p810_p2)
}
   0xb   :  { %s814_s10 = scalar_lea.vmem %s33_s25, 512  ;;  %p819_p4 = scmp.lt.s32.totalorder %s33_s25, %s33_s25 }
   0xc   :  { %p815_p3 = scmp.ne.s32.totalorder %s33_s25, %s814_s10  ;;  %p820_p5 = scmp.lt.s32.totalorder %s814_s10, %s814_s10 }
   0xe   :  { %p821_p6 = por %p820_p5, %p819_p4 }
  0x10   :  { %p822_p7 = pnand %p821_p6, %p815_p3 }
  0x12   :  { %825 = shalt.err (!%p822_p7)
}
  0x13   :  { %s991_s11 = smov 128   ;;  %s992_s12 = smov 8  }
  0x14   :  { %38 = dma.hbm_to_vmem [thread:$0]  %s1140_s1, 512, %s33_s25, [#allocation6], %s991_s11, %s991_s11, %s992_s12  }
  0x15   :  { %s993_s15 = smov [#allocation8]   ;;  %s994_s17 = smov [#allocation11]  }
  0x16   :  { %s54_s16 = sshll.u32 %s993_s15, 4  ;;  %s76_s18 = sshll.u32 %s994_s17, 4  ;;  %s55_s16 = int_to_ptr.vmem [resolvable:$true] %s54_s16  ;;  %s77_s18 = int_to_ptr.vmem [resolvable:$true] %s76_s18 }
  0x17   :  { %s826_s21 = scalar_lea.hbm %s1142_s3, 4096 }
  0x18   :  { %p827_p8 = scmp.ne.s32.totalorder %s1142_s3, %s826_s21  ;;  %p830_p9 = scmp.lt.u32.totalorder %s826_s21, %s1142_s3 }
  0x1a   :  { %p832_p10 = pnand %p830_p9, %p827_p8 }
  0x1c   :  { %835 = shalt.err (!%p832_p10)
}
  0x1d   :  { %s836_s1 = scalar_lea.vmem %s55_s16, 4096  ;;  %p841_p12 = scmp.lt.s32.totalorder %s55_s16, %s55_s16 }
  0x1e   :  { %p837_p11 = scmp.ne.s32.totalorder %s55_s16, %s836_s1  ;;  %p842_p13 = scmp.lt.s32.totalorder %s836_s1, %s836_s1 }
  0x20   :  { %p843_p0 = por %p842_p13, %p841_p12 }
  0x22   :  { %p844_p1 = pnand %p843_p0, %p837_p11 }
  0x24   :  { %847 = shalt.err (!%p844_p1)
}
  0x25   :  { %60 = dma.hbm_to_vmem [thread:$0]  %s1142_s3, 4096, %s55_s16, [#allocation9], %s991_s11, %s991_s11, %s992_s12  }
  0x26   :  { %s848_s30 = scalar_lea.hbm %s1144_s5, 2048 }
  0x27   :  { %p849_p2 = scmp.ne.s32.totalorder %s1144_s5, %s848_s30  ;;  %p852_p3 = scmp.lt.u32.totalorder %s848_s30, %s1144_s5 }
  0x29   :  { %p854_p4 = pnand %p852_p3, %p849_p2 }
  0x2b   :  { %857 = shalt.err (!%p854_p4)
}
  0x2c   :  { %s858_s14 = scalar_lea.vmem %s77_s18, 2048  ;;  %p863_p6 = scmp.lt.s32.totalorder %s77_s18, %s77_s18 }
  0x2d   :  { %p859_p5 = scmp.ne.s32.totalorder %s77_s18, %s858_s14  ;;  %p864_p7 = scmp.lt.s32.totalorder %s858_s14, %s858_s14 }
  0x2f   :  { %p865_p8 = por %p864_p7, %p863_p6 }
  0x31   :  { %p866_p9 = pnand %p865_p8, %p859_p5 }
  0x33   :  { %869 = shalt.err (!%p866_p9)
}
  0x34   :  { %s995_s3 = smov 64   ;;  %s996_s11 = smov 4  }
  0x35   :  { %82 = dma.hbm_to_vmem [thread:$0]  %s1144_s5, 2048, %s77_s18, [#allocation12], %s995_s3, %s995_s3, %s996_s11  }
  0x36   :  { %s997_s16 = smov [#allocation2]   ;;  %s998_s19 = smov [#allocation7]  }
  0x37   :  { %s23_s17 = sshll.u32 %s997_s16, 4  ;;  %s45_s20 = sshll.u32 %s998_s19, 4  ;;  %s24_s17 = int_to_ptr.vmem [resolvable:$true] %s23_s17  ;;  %s46_s20 = int_to_ptr.vmem [resolvable:$true] %s45_s20 }
  0x38   :  { %s870_s23 = scalar_lea.hbm %s1139_s0, 128 }
  0x39   :  { %p871_p10 = scmp.ne.s32.totalorder %s1139_s0, %s870_s23  ;;  %p874_p11 = scmp.lt.u32.totalorder %s870_s23, %s1139_s0 }
  0x3b   :  { %p876_p12 = pnand %p874_p11, %p871_p10 }
  0x3d   :  { %879 = shalt.err (!%p876_p12)
}
  0x3e   :  { %s880_s5 = scalar_lea.vmem %s24_s17, 128  ;;  %p885_p0 = scmp.lt.s32.totalorder %s24_s17, %s24_s17 }
  0x3f   :  { %p881_p13 = scmp.ne.s32.totalorder %s24_s17, %s880_s5  ;;  %p886_p1 = scmp.lt.s32.totalorder %s880_s5, %s880_s5 }
  0x41   :  { %p887_p2 = por %p886_p1, %p885_p0 }
  0x43   :  { %p888_p3 = pnand %p887_p2, %p881_p13 }
  0x45   :  { %891 = shalt.err (!%p888_p3)
}
  0x46   :  { %26 = dma.hbm_to_vmem [thread:$0]  %s1139_s0, 128, %s24_s17, [#allocation3]  }
  0x47   :  { %s892_s30 = scalar_lea.hbm %s1141_s2, 32 }
  0x48   :  { %p893_p4 = scmp.ne.s32.totalorder %s1141_s2, %s892_s30  ;;  %p896_p5 = scmp.lt.u32.totalorder %s892_s30, %s1141_s2 }
  0x4a   :  { %p898_p6 = pnand %p896_p5, %p893_p4 }
  0x4c   :  { %901 = shalt.err (!%p898_p6)
}
  0x4d   :  { %s902_s14 = scalar_lea.vmem %s46_s20, 32  ;;  %p907_p8 = scmp.lt.s32.totalorder %s46_s20, %s46_s20 }
  0x4e   :  { %p903_p7 = scmp.ne.s32.totalorder %s46_s20, %s902_s14  ;;  %p908_p9 = scmp.lt.s32.totalorder %s902_s14, %s902_s14 }
  0x50   :  { %p909_p10 = por %p908_p9, %p907_p8 }
  0x52   :  { %p910_p11 = pnand %p909_p10, %p903_p7 }
  0x54   :  { %913 = shalt.err (!%p910_p11)
}
  0x55   :  { %48 = dma.hbm_to_vmem [thread:$0]  %s1141_s2, 32, %s46_s20, [#allocation6]  }
  0x56   :  { %s999_s11 = smov [#allocation10]   ;;  %s1000_s15 = smov [#allocation13]  }
  0x57   :  { %s67_s12 = sshll.u32 %s999_s11, 4  ;;  %s89_s16 = sshll.u32 %s1000_s15, 4  ;;  %s68_s12 = int_to_ptr.vmem [resolvable:$true] %s67_s12  ;;  %s90_s16 = int_to_ptr.vmem [resolvable:$true] %s89_s16 }
  0x58   :  { %s914_s21 = scalar_lea.hbm %s1143_s4, 32 }
  0x59   :  { %p915_p12 = scmp.ne.s32.totalorder %s1143_s4, %s914_s21  ;;  %p918_p13 = scmp.lt.u32.totalorder %s914_s21, %s1143_s4 }
  0x5b   :  { %p920_p0 = pnand %p918_p13, %p915_p12 }
  0x5d   :  { %923 = shalt.err (!%p920_p0)
}
  0x5e   :  { %s924_s2 = scalar_lea.vmem %s68_s12, 32  ;;  %p929_p2 = scmp.lt.s32.totalorder %s68_s12, %s68_s12 }
  0x5f   :  { %p925_p1 = scmp.ne.s32.totalorder %s68_s12, %s924_s2  ;;  %p930_p3 = scmp.lt.s32.totalorder %s924_s2, %s924_s2 }
  0x61   :  { %p931_p4 = por %p930_p3, %p929_p2 }
  0x63   :  { %p932_p5 = pnand %p931_p4, %p925_p1 }
  0x65   :  { %935 = shalt.err (!%p932_p5)
}
  0x66   :  { %70 = dma.hbm_to_vmem [thread:$0]  %s1143_s4, 32, %s68_s12, [#allocation9]  }
  0x67   :  { %s936_s18 = scalar_lea.hbm %s1145_s6, 16 }
  0x68   :  { %p937_p6 = scmp.ne.s32.totalorder %s1145_s6, %s936_s18  ;;  %p940_p7 = scmp.lt.u32.totalorder %s936_s18, %s1145_s6 }
  0x6a   :  { %p942_p8 = pnand %p940_p7, %p937_p6 }
  0x6c   :  { %945 = shalt.err (!%p942_p8)
}
  0x6d   :  { %s946_s8 = scalar_lea.vmem %s90_s16, 16  ;;  %s950_s9 = scalar_lea.vmem %s90_s16, 32 }
  0x6e   :  { %p947_p9 = scmp.ne.s32.totalorder %s90_s16, %s946_s8  ;;  %p951_p10 = scmp.lt.s32.totalorder %s90_s16, %s90_s16 }
  0x6f   :  { %p952_p11 = scmp.lt.s32.totalorder %s950_s9, %s946_s8 }
  0x71   :  { %p953_p12 = por %p952_p11, %p951_p10 }
  0x73   :  { %p954_p13 = pnand %p953_p12, %p947_p9 }
  0x75   :  { %957 = shalt.err (!%p954_p13)
}
  0x76   :  { %92 = dma.hbm_to_vmem [thread:$0]  %s1145_s6, 16, %s90_s16, [#allocation12]  }
  0x77   :  { %980 = dma.done.wait [#allocation3], 128  }
  0x78   :  { %981 = vsyncadd [#allocation3], 4294967168 }
  0x79   :  { %982 = dma.done.wait [#allocation6], 544  }
  0x7a   :  { %983 = vsyncadd [#allocation6], 4294966752 }
  0x7b   :  { %984 = dma.done.wait [#allocation9], 4128  }
  0x7c   :  { %985 = vsyncadd [#allocation9], 4294963168 }
  0x7d   :  { %986 = dma.done.wait [#allocation12], 2064  }
  0x7e   :  { %987 = vsyncadd [#allocation12], 4294965232  ;;  %v1001_v0 = vmov 0   ;;  %v734_v1 = vld [vmem:[#allocation5 + $0x4] ss:$8 sps:$4 sm:$0xff]   ;;  %v115_v5 = vld [vmem:[#allocation2] sm:$0xff]  ;;  %v123_v51 = vlaneseq }
  0x7f   :  { %189 = vmatprep.mubr.bf16.mxu0 %v1001_v0  ;;  %v736_v2 = vld [vmem:[#allocation5] ss:$8 sps:$4 sm:$0xff]   ;;  %157 = vmatprep.subr.bf16.mxu0 %v734_v1  ;;  %v737_v3 = vld [vmem:[#allocation5 + $0x14] ss:$8 sps:$4 sm:$0xff]   ;;  %v739_v4 = vld [vmem:[#allocation5 + $0x10] ss:$8 sps:$4 sm:$0xff]   ;;  %v116_v9 = vpack.c.bf16 %v115_v5, %v115_v5 }
  0x80   :  { %158 = vmatpush1.bf16.msra.mxu0 %v736_v2  ;;  %v740_v6 = vld [vmem:[#allocation8 + $0x4] ss:$8 sps:$4 sm:$0xff]   ;;  %v742_v7 = vld [vmem:[#allocation8] ss:$8 sps:$4 sm:$0xff]   ;;  %v743_v8 = vld [vmem:[#allocation8 + $0x14] ss:$8 sps:$4 sm:$0xff]  }
  0x81   :  { %159 = vmatprep.subr.bf16.mxu0 %v737_v3  ;;  %406 = vmatprep.subr.bf16.mxu1 %v740_v6  ;;  %v745_v10 = vld [vmem:[#allocation8 + $0x10] ss:$8 sps:$4 sm:$0xff]   ;;  %vm153_vm0 = vcmask 261120   ;;  %v746_v11 = vld [vmem:[#allocation8 + $0x24] ss:$8 sps:$4 sm:$0xff]   ;;  %v124_v52 = vshrl.u32 %v123_v51, 7 }
  0x82   :  { %407 = vmatpush1.bf16.msra.mxu1 %v742_v7  ;;  %v748_v12 = vld [vmem:[#allocation8 + $0x20] ss:$8 sps:$4 sm:$0xff]   ;;  %v749_v13 = vld [vmem:[#allocation8 + $0x34] ss:$8 sps:$4 sm:$0xff]   ;;  %v751_v14 = vld [vmem:[#allocation8 + $0x30] ss:$8 sps:$4 sm:$0xff]  }
  0x83   :  { %408 = vmatprep.subr.bf16.mxu1 %v743_v8  ;;  %v752_v15 = vld [vmem:[#allocation8 + $0x44] ss:$8 sps:$4 sm:$0xff]   ;;  %v754_v16 = vld [vmem:[#allocation8 + $0x40] ss:$8 sps:$4 sm:$0xff]   ;;  %v755_v17 = vld [vmem:[#allocation8 + $0x54] ss:$8 sps:$4 sm:$0xff]  }
  0x84   :  { %160 = vmatpush1.bf16.msra.mxu0 %v739_v4  ;;  %v757_v18 = vld [vmem:[#allocation8 + $0x50] ss:$8 sps:$4 sm:$0xff]   ;;  %v758_v19 = vld [vmem:[#allocation8 + $0x64] ss:$8 sps:$4 sm:$0xff]   ;;  %v760_v20 = vld [vmem:[#allocation8 + $0x60] ss:$8 sps:$4 sm:$0xff]  }
  0x85   :  { %v761_v21 = vld [vmem:[#allocation8 + $0x74] ss:$8 sps:$4 sm:$0xff]   ;;  %v763_v22 = vld [vmem:[#allocation8 + $0x70] ss:$8 sps:$4 sm:$0xff]   ;;  %v764_v23 = vld [vmem:[#allocation8 + $0x84] ss:$8 sps:$4 sm:$0xff]  }
  0x86   :  { %409 = vmatpush1.bf16.msra.mxu1 %v745_v10  ;;  %v766_v24 = vld [vmem:[#allocation8 + $0x80] ss:$8 sps:$4 sm:$0xff]   ;;  %v767_v25 = vld [vmem:[#allocation8 + $0x94] ss:$8 sps:$4 sm:$0xff]   ;;  %v769_v26 = vld [vmem:[#allocation8 + $0x90] ss:$8 sps:$4 sm:$0xff]  }
  0x87   :  { %649 = vmatmul.mubr.msk.bf16.vlgmr.msra.gmra.mrb[0].mxu0 %vm153_vm0, %v116_v9  ;;  %410 = vmatprep.subr.bf16.mxu1 %v746_v11  ;;  %v770_v27 = vld [vmem:[#allocation8 + $0xa4] ss:$8 sps:$4 sm:$0xff]   ;;  %v772_v28 = vld [vmem:[#allocation8 + $0xa0] ss:$8 sps:$4 sm:$0xff]   ;;  %v773_v29 = vld [vmem:[#allocation8 + $0xb4] ss:$8 sps:$4 sm:$0xff]  }
  0x88   :  { %v775_v30 = vld [vmem:[#allocation8 + $0xb0] ss:$8 sps:$4 sm:$0xff]   ;;  %v776_v31 = vld [vmem:[#allocation8 + $0xc4] ss:$8 sps:$4 sm:$0xff]   ;;  %v778_v32 = vld [vmem:[#allocation8 + $0xc0] ss:$8 sps:$4 sm:$0xff]  }
  0x89   :  { %v779_v33 = vld [vmem:[#allocation8 + $0xd4] ss:$8 sps:$4 sm:$0xff]   ;;  %v781_v34 = vld [vmem:[#allocation8 + $0xd0] ss:$8 sps:$4 sm:$0xff]   ;;  %v782_v35 = vld [vmem:[#allocation8 + $0xe4] ss:$8 sps:$4 sm:$0xff]  }
  0x8a   :  { %411 = vmatpush1.bf16.msra.mxu1 %v748_v12  ;;  %v784_v36 = vld [vmem:[#allocation8 + $0xe0] ss:$8 sps:$4 sm:$0xff]   ;;  %v785_v37 = vld [vmem:[#allocation8 + $0xf4] ss:$8 sps:$4 sm:$0xff]   ;;  %v787_v38 = vld [vmem:[#allocation8 + $0xf0] ss:$8 sps:$4 sm:$0xff]  }
  0x8b   :  { %412 = vmatprep.subr.bf16.mxu1 %v749_v13  ;;  %v788_v39 = vld [vmem:[#allocation11 + $0x40] sm:$0xff]   ;;  %v790_v41 = vld [vmem:[#allocation11 + $0x48] sm:$0xff]   ;;  %v792_v43 = vld [vmem:[#allocation11 + $0x50] sm:$0xff]   ;;  %v125_v53 = vsub.s32 0, %v124_v52  ;;  %v129_v55 = vsub.s32 1, %v124_v52  ;;  %s1002_s6 = smov [#allocation14]  }
  0x8c   :  { %v789_v40 = vld [vmem:[#allocation11] sm:$0xff]   ;;  %699 = vmatprep.subr.bf16.mxu0 %v788_v39  ;;  %v791_v42 = vld [vmem:[#allocation11 + $0x8] sm:$0xff]   ;;  %v793_v44 = vld [vmem:[#allocation11 + $0x10] sm:$0xff]   ;;  %s633_s13 = sshll.u32 %s1002_s6, 4  ;;  %s634_s13 = int_to_ptr.vmem [resolvable:$true] %s633_s13 }
  0x8d   :  { %700 = vmatpush3.bf16.msra.mxu0 %v789_v40  ;;  %v794_v45 = vld [vmem:[#allocation11 + $0x58] sm:$0xff]   ;;  %v796_v47 = vld [vmem:[#allocation11 + $0x60] sm:$0xff]   ;;  %v798_v49 = vld [vmem:[#allocation11 + $0x68] sm:$0xff]   ;;  %s958_s14 = scalar_lea.vmem %s634_s13, 128  ;;  %p963_p1 = scmp.lt.s32.totalorder %s634_s13, %s634_s13 }
  0x8e   :  { %413 = vmatpush1.bf16.msra.mxu1 %v751_v14  ;;  %701 = vmatprep.subr.bf16.mxu0 %v790_v41  ;;  %v795_v46 = vld [vmem:[#allocation11 + $0x18] sm:$0xff]   ;;  %v797_v48 = vld [vmem:[#allocation11 + $0x20] sm:$0xff]   ;;  %v799_v50 = vld [vmem:[#allocation11 + $0x28] sm:$0xff]   ;;  %p959_p0 = scmp.ne.s32.totalorder %s634_s13, %s958_s14  ;;  %p964_p2 = scmp.lt.s32.totalorder %s958_s14, %s958_s14 }
  0x8f   :  { %414 = vmatprep.subr.bf16.mxu1 %v752_v15  ;;  %v121_v54 = vld [vmem:[#allocation7] sm:$0x3]  ;;  %v800_v4 = vld [vmem:[#allocation11 + $0x70] sm:$0xff]   ;;  %v234_v8 = vld [vmem:[#allocation10] sm:$0x3] }
  0x90   :  { %v126_v56 = vrot.slane %v121_v54, %v125_v53  ;;  %v130_v57 = vrot.slane %v121_v54, %v129_v55  ;;  %v801_v5 = vld [vmem:[#allocation11 + $0x30] sm:$0xff]   ;;  %v802_v6 = vld [vmem:[#allocation11 + $0x78] sm:$0xff]   ;;  %v239_v9 = vrot.slane %v234_v8, %v125_v53  ;;  %v243_v10 = vrot.slane %v234_v8, %v129_v55  ;;  %p965_p3 = por %p964_p2, %p963_p1 }
  0x91   :  { %702 = vmatpush3.bf16.msra.mxu0 %v791_v42  ;;  %v803_v7 = vld [vmem:[#allocation11 + $0x38] sm:$0xff]  }
  0x92   :  { %415 = vmatpush1.bf16.msra.mxu1 %v754_v16  ;;  %703 = vmatprep.subr.bf16.mxu0 %v792_v43  ;;  %p966_p4 = pnand %p965_p3, %p959_p0 }
  0x93   :  { %416 = vmatprep.subr.bf16.mxu1 %v755_v17 }
  0x95   :  { %704 = vmatpush3.bf16.msra.mxu0 %v793_v44 }
  0x96   :  { %417 = vmatpush1.bf16.msra.mxu1 %v757_v18  ;;  %705 = vmatprep.subr.bf16.mxu0 %v794_v45 }
  0x97   :  { %418 = vmatprep.subr.bf16.mxu1 %v758_v19 }
  0x99   :  { %706 = vmatpush3.bf16.msra.mxu0 %v795_v46 }
  0x9a   :  { %419 = vmatpush1.bf16.msra.mxu1 %v760_v20  ;;  %707 = vmatprep.subr.bf16.mxu0 %v796_v47 }
  0x9b   :  { %420 = vmatprep.subr.bf16.mxu1 %v761_v21 }
  0x9d   :  { %708 = vmatpush3.bf16.msra.mxu0 %v797_v48 }
  0x9e   :  { %421 = vmatpush1.bf16.msra.mxu1 %v763_v22  ;;  %709 = vmatprep.subr.bf16.mxu0 %v798_v49  ;;  %v682_v22 = vld [vmem:[#allocation13] ss:$0 sm:$0xff] }
  0x9f   :  { %422 = vmatprep.subr.bf16.mxu1 %v764_v23 }
  0xa1   :  { %710 = vmatpush3.bf16.msra.mxu0 %v799_v50 }
  0xa2   :  { %423 = vmatpush1.bf16.msra.mxu1 %v766_v24  ;;  %711 = vmatprep.subr.bf16.mxu0 %v800_v4 }
  0xa3   :  { %424 = vmatprep.subr.bf16.mxu1 %v767_v25 }
  0xa5   :  { %712 = vmatpush3.bf16.msra.mxu0 %v801_v5 }
  0xa6   :  { %425 = vmatpush1.bf16.msra.mxu1 %v769_v26  ;;  %713 = vmatprep.subr.bf16.mxu0 %v802_v6 }
  0xa7   :  { %426 = vmatprep.subr.bf16.mxu1 %v770_v27 }
  0xa9   :  { %714 = vmatpush3.bf16.msra.mxu0 %v803_v7 }
  0xaa   :  { %427 = vmatpush1.bf16.msra.mxu1 %v772_v28 }
  0xab   :  { %428 = vmatprep.subr.bf16.mxu1 %v773_v29 }
  0xae   :  { %429 = vmatpush1.bf16.msra.mxu1 %v775_v30 }
  0xaf   :  { %430 = vmatprep.subr.bf16.mxu1 %v776_v31 }
  0xb2   :  { %431 = vmatpush1.bf16.msra.mxu1 %v778_v32 }
  0xb3   :  { %432 = vmatprep.subr.bf16.mxu1 %v779_v33 }
  0xb6   :  { %433 = vmatpush1.bf16.msra.mxu1 %v781_v34 }
  0xb7   :  { %434 = vmatprep.subr.bf16.mxu1 %v782_v35 }
  0xba   :  { %435 = vmatpush1.bf16.msra.mxu1 %v784_v36 }
  0xbb   :  { %436 = vmatprep.subr.bf16.mxu1 %v785_v37 }
  0xbe   :  { %437 = vmatpush1.bf16.msra.mxu1 %v787_v38 }
 0x15a   :  { %v191_v58 = vpop.f32.mrb[0].mxu0 }
 0x15b   :  { %v192_v59 = vadd.f32 %v191_v58, %v126_v56  ;;  %v193_v60 = vpop.f32.mrb[1].mxu0 }
 0x15c   :  { %v194_v61 = vadd.f32 %v193_v60, %v130_v57  ;;  %v195_v62 = vpop.f32.mrb[2].mxu0 }
 0x15d   :  { %v198_v63 = vmax.f32 %v192_v59, 0.0  ;;  %v196_v0 = vpop.f32.mrb[3].mxu0 }
 0x15e   :  { %v199_v1 = vmax.f32 %v194_v61, 0.0 }
 0x15f   :  { %v200_v3 = vpack.c.bf16 %v198_v63, %v198_v63 }
 0x160   :  { %v201_v2 = vpack.c.bf16 %v199_v1, %v199_v1 }
 0x162   :  { %438 = vmatprep.mubr.bf16.mxu1 %v201_v2 }
 0x163   :  { %439 = vmatmul.mubr.bf16.vlgmr.msra.gmra.mrb[0].mxu1 %v200_v3 }
 0x236   :  { %v440_v11 = vpop.f32.mrb[0].mxu1 }
 0x237   :  { %v441_v12 = vadd.f32 %v440_v11, %v239_v9  ;;  %v442_v13 = vpop.f32.mrb[1].mxu1 }
 0x238   :  { %v443_v14 = vadd.f32 %v442_v13, %v243_v10  ;;  %v444_v15 = vpop.f32.mrb[2].mxu1 }
 0x239   :  { %v447_v16 = vmax.f32 %v441_v12, 0.0  ;;  %v445_v17 = vpop.f32.mrb[3].mxu1 }
 0x23a   :  { %v448_v18 = vmax.f32 %v443_v14, 0.0 }
 0x23b   :  { %v449_v20 = vpack.c.bf16 %v447_v16, %v447_v16 }
 0x23c   :  { %v450_v19 = vpack.c.bf16 %v448_v18, %v448_v18 }
 0x23e   :  { %618 = vmatprep.mubr.bf16.mxu0 %v450_v19 }
 0x23f   :  { %619 = vmatmul.mubr.bf16.vlgmr.msra.gmra.mrb[4].mxu0 %v449_v20 }
 0x312   :  { %v715_v21 = vpop.f32.mrb[4].mxu0 }
 0x313   :  { %v716_v23 = vpop.f32.mrb[5].mxu0 }
 0x314   :  { %v717_v24 = vadd.f32 %v716_v23, %v715_v21  ;;  %v718_v25 = vpop.f32.mrb[6].mxu0 }
 0x315   :  { %v719_v26 = vpop.f32.mrb[7].mxu0 }
 0x316   :  { %v621_v27 = vadd.f32 %v717_v24, %v682_v22 }
 0x318   :  { %626 = vst [vmem:[#allocation14] sm:$0xff] %v621_v27 }
 0x319   :  { %969 = shalt.err (!%p966_p4)
}
 0x31a   :  { %s970_s11 = scalar_lea.hbm %s1146_s7, 128 }
 0x31b   :  { %p971_p5 = scmp.ne.s32.totalorder %s1146_s7, %s970_s11  ;;  %p974_p6 = scmp.lt.u32.totalorder %s970_s11, %s1146_s7 }
 0x31d   :  { %p976_p7 = pnand %p974_p6, %p971_p5 }
 0x31f   :  { %979 = shalt.err (!%p976_p7)
}
 0x320   :  { %636 = dma.vmem_to_hbm [thread:$0]  %s634_s13, 128, %s1146_s7, [#allocation4]  }
 0x321   :  { %988 = dma.done.wait [#allocation4], 128  }
 0x322   :  { %989 = vsyncadd [#allocation4], 4294967168 }
 0x323   :  { %640 = vsyncpa [#allocation3], 1 }
 0x324   :  { %641 = vsyncpa [#allocation6], 1 }
 0x325   :  { %642 = vsyncpa [#allocation9], 1 }
 0x326   :  { %643 = vsyncpa [#allocation12], 1 }
 0x327   :  { %644 = vsyncpa [#allocation4], 1 }

</bundles_post_ra>
